<compile_context>
chip_gen: v5e
topology: v5e:2x2
jax: 0.10.0
libtpu: 0.0.40
codegen_flags: <defaults>
</compile_context>

<pallas_src>
import functools

import jax
import jax.numpy as jnp
from jax import lax
from jax.experimental import pallas as pl
from jax.experimental.pallas import tpu as pltpu

attr_num = 18
attr_dict_size = 2 * attr_num            # 36
attr_present_dim = 5
hidden_dim = 100
user_emb_dim = attr_num                  # 18
feat_dim = attr_num * attr_present_dim   # 90


def _round_up(x, m):
    return (x + m - 1) // m * m


def _generator_kernel(ids_ref, m_ref, b1_ref, w2_ref, b2_ref, w3_ref, b3_ref, o_ref):
    # ids_ref : [tile_b, 18] int32
    # m_ref   : [18, 36, 100] bf16   (embedding folded into W1)
    # b*_ref  : [1, out] f32,  w2/w3 : [in, out] bf16
    # o_ref   : [tile_b, 18] f32
    tile_b = ids_ref.shape[0]
    ids = ids_ref[...]                                                  # [tile_b, 18]
    tok = lax.broadcasted_iota(jnp.int32, (tile_b, attr_dict_size), 1)  # [tile_b, 36]

    # Layer 1 (embedding + L1 fused): sum over the 18 attribute slots of a
    # one-hot row-select from M[a]. one-hot entries are exactly representable
    # in bf16, accumulation is f32, so the select itself is exact.
    acc = jnp.zeros((tile_b, hidden_dim), jnp.float32)
    for a in range(attr_num):
        one_hot = (ids[:, a:a + 1] == tok).astype(jnp.bfloat16)         # [tile_b, 36]
        acc = acc + jnp.dot(one_hot, m_ref[a],                          # [36, 100]
                            preferred_element_type=jnp.float32)
    h1 = jnp.tanh(acc + b1_ref[...])

    h2 = jnp.tanh(
        jnp.dot(h1.astype(jnp.bfloat16), w2_ref[...],
                preferred_element_type=jnp.float32) + b2_ref[...]
    )
    o_ref[...] = jnp.tanh(
        jnp.dot(h2.astype(jnp.bfloat16), w3_ref[...],
                preferred_element_type=jnp.float32) + b3_ref[...]
    )


@functools.partial(jax.jit, static_argnames=("tile_b",))
def generator_forward(attribute_id, params, tile_b=512):
    """attribute_id: int [B, attr_num]; returns float32 [B, user_emb_dim]."""
    emb, w1, b1, w2, b2, w3, b3 = (
        params["emb"], params["w1"], params["b1"],
        params["w2"], params["b2"], params["w3"], params["b3"],
    )
    B = attribute_id.shape[0]

    # Match jnp.take's clamp-on-OOB semantics of the original glue path.
    ids = jnp.clip(attribute_id.astype(jnp.int32), 0, attr_dict_size - 1)

    # Fold embedding table into layer-1 weights: M[a, t, :] = emb[t] @ W1[a*5:(a+1)*5].
    m = jnp.einsum(
        "tv,avh->ath", emb, w1.reshape(attr_num, attr_present_dim, hidden_dim)
    )
    m_bf = m.astype(jnp.bfloat16)
    w2_bf = w2.astype(jnp.bfloat16)
    w3_bf = w3.astype(jnp.bfloat16)

    # Batch tiling: tile is a multiple of 8 sublanes; pad the last tile with id 0
    # rows (computed then discarded).
    tile = min(_round_up(tile_b, 8), _round_up(B, 8))
    b_pad = _round_up(B, tile)
    if b_pad != B:
        ids = jnp.pad(ids, ((0, b_pad - B), (0, 0)))
    grid = (b_pad // tile,)

    def batch_spec(width):
        return pl.BlockSpec((tile, width), lambda i: (i, 0))

    def resident(shape):
        return pl.BlockSpec(shape, lambda i, _n=len(shape): (0,) * _n)

    out = pl.pallas_call(
        _generator_kernel,
        out_shape=jax.ShapeDtypeStruct((b_pad, user_emb_dim), jnp.float32),
        grid=grid,
        in_specs=[
            batch_spec(attr_num),                               # ids        (tiled)
            resident((attr_num, attr_dict_size, hidden_dim)),   # M          (resident)
            resident((1, hidden_dim)),                          # b1
            resident((hidden_dim, hidden_dim)),                 # w2
            resident((1, hidden_dim)),                          # b2
            resident((hidden_dim, user_emb_dim)),               # w3
            resident((1, user_emb_dim)),                        # b3
        ],
        out_specs=batch_spec(user_emb_dim),
        compiler_params=pltpu.CompilerParams(
            dimension_semantics=("parallel",),
        ),
    )(ids, m_bf, b1, w2_bf, b2, w3_bf, b3)
    return out[:B]


def _xavier_normal(key, shape):
    # nn.init.xavier_normal_ : std = sqrt(2 / (fan_in + fan_out)) (orientation-agnostic)
    fan_in, fan_out = shape[-2], shape[-1]
    std = (2.0 / (fan_in + fan_out)) ** 0.5
    return std * jax.random.normal(key, shape, dtype=jnp.float32)


def init_params(key):
    ks = jax.random.split(key, 7)
    return {
        # Embedding table [36, 5]
        "emb": _xavier_normal(ks[0], (attr_dict_size, attr_present_dim)),
        # Linear weights stored as [in, out]; biases as [1, out]
        "w1": _xavier_normal(ks[1], (feat_dim, hidden_dim)),
        "b1": _xavier_normal(ks[2], (1, hidden_dim)),
        "w2": _xavier_normal(ks[3], (hidden_dim, hidden_dim)),
        "b2": _xavier_normal(ks[4], (1, hidden_dim)),
        "w3": _xavier_normal(ks[5], (hidden_dim, user_emb_dim)),
        "b3": _xavier_normal(ks[6], (1, user_emb_dim)),
    }


def generator_reference(attribute_id, params):
    """Pure-f32 JAX reference of the PyTorch forward."""
    attr_present = jnp.take(params["emb"], attribute_id.astype(jnp.int32), axis=0)
    x = attr_present.reshape(attribute_id.shape[0], feat_dim)
    h1 = jnp.tanh(x @ params["w1"] + params["b1"])
    h2 = jnp.tanh(h1 @ params["w2"] + params["b2"])
    return jnp.tanh(h2 @ params["w3"] + params["b3"])


if __name__ == "__main__":
    key = jax.random.PRNGKey(0)
    pkey, dkey, dkey2 = jax.random.split(key, 3)
    params = init_params(pkey)

    # Small-shape check (single tile).
    B = 8
    attribute_id = jax.random.randint(
        dkey, (B, attr_num), minval=0, maxval=attr_dict_size, dtype=jnp.int32
    )
    out = jax.block_until_ready(generator_forward(attribute_id, params))
    ref = generator_reference(attribute_id, params)
    assert out.shape == (B, user_emb_dim), out.shape
    # bf16 matmul operands -> relaxed tolerance vs the f32 reference.
    assert jnp.allclose(out, ref, atol=2e-2, rtol=2e-2), (
        "mismatch vs reference:", float(jnp.max(jnp.abs(out - ref)))
    )

    # Multi-tile + ragged-batch check (exercises grid tiling and padding path).
    B2 = 200
    attribute_id2 = jax.random.randint(
        dkey2, (B2, attr_num), minval=0, maxval=attr_dict_size, dtype=jnp.int32
    )
    out2 = jax.block_until_ready(generator_forward(attribute_id2, params, tile_b=64))
    ref2 = generator_reference(attribute_id2, params)
    assert out2.shape == (B2, user_emb_dim), out2.shape
    assert jnp.allclose(out2, ref2, atol=2e-2, rtol=2e-2), (
        "mismatch vs reference (tiled):", float(jnp.max(jnp.abs(out2 - ref2)))
    )

    print("KERNEL_OK")
</pallas_src>

<mosaic_0001>
module attributes {stable_mosaic.version = 11 : i64} {
  func.func @_generator_kernel(%arg0: i32, %arg1: memref<8x18xi32, #tpu.memory_space<vmem>>, %arg2: memref<18x36x100xbf16, #tpu.memory_space<vmem>>, %arg3: memref<1x100xf32, #tpu.memory_space<vmem>>, %arg4: memref<100x100xbf16, #tpu.memory_space<vmem>>, %arg5: memref<1x100xf32, #tpu.memory_space<vmem>>, %arg6: memref<100x18xbf16, #tpu.memory_space<vmem>>, %arg7: memref<1x18xf32, #tpu.memory_space<vmem>>, %arg8: memref<8x18xf32, #tpu.memory_space<vmem>>) attributes {dimension_semantics = [#tpu.dimension_semantics<parallel>], iteration_bounds = array<i64: 1>, scalar_prefetch = 0 : i64, scratch_operands = 0 : i64, tpu.core_type = #tpu.core_type<tc>, window_params = [{transform_indices = @transform_0, window_bounds = array<i64: 8, 18>}, {pipeline_mode = #tpu.pipeline_mode<synchronous>, transform_indices = @transform_1, window_bounds = array<i64: 18, 36, 100>}, {pipeline_mode = #tpu.pipeline_mode<synchronous>, transform_indices = @transform_2, window_bounds = array<i64: 1, 100>}, {pipeline_mode = #tpu.pipeline_mode<synchronous>, transform_indices = @transform_3, window_bounds = array<i64: 100, 100>}, {pipeline_mode = #tpu.pipeline_mode<synchronous>, transform_indices = @transform_4, window_bounds = array<i64: 1, 100>}, {pipeline_mode = #tpu.pipeline_mode<synchronous>, transform_indices = @transform_5, window_bounds = array<i64: 100, 18>}, {pipeline_mode = #tpu.pipeline_mode<synchronous>, transform_indices = @transform_6, window_bounds = array<i64: 1, 18>}, {transform_indices = @transform_7, window_bounds = array<i64: 8, 18>}]} {
    %c0 = arith.constant 0 : index
    %c0_0 = arith.constant 0 : index
    %0 = vector.load %arg1[%c0, %c0_0] : memref<8x18xi32, #tpu.memory_space<vmem>>, vector<8x18xi32>
    %1 = tpu.iota {dimensions = array<i32: 1>} : vector<8x36xi32>
    %cst = arith.constant 0.000000e+00 : f32
    %2 = vector.broadcast %cst : f32 to vector<8x100xf32>
    %3 = vector.extract_strided_slice %0 {offsets = [0, 0], sizes = [8, 1], strides = [1, 1]} : vector<8x18xi32> to vector<8x1xi32>
    %4 = vector.broadcast %3 : vector<8x1xi32> to vector<8x36xi32>
    %5 = arith.cmpi eq, %4, %1 : vector<8x36xi32>
    %6 = arith.extui %5 : vector<8x36xi1> to vector<8x36xi32>
    %7 = arith.sitofp %6 : vector<8x36xi32> to vector<8x36xf32>
    %8 = arith.truncf %7 : vector<8x36xf32> to vector<8x36xbf16>
    %c0_1 = arith.constant 0 : index
    %c0_2 = arith.constant 0 : index
    %c0_3 = arith.constant 0 : index
    %9 = vector.load %arg2[%c0_1, %c0_2, %c0_3] : memref<18x36x100xbf16, #tpu.memory_space<vmem>>, vector<1x36x100xbf16>
    %10 = vector.shape_cast %9 : vector<1x36x100xbf16> to vector<36x100xbf16>
    %cst_4 = arith.constant dense<0.000000e+00> : vector<8x100xf32>
    %11 = tpu.matmul %8, %10, %cst_4 {dimension_numbers = #tpu.dot_dimension_numbers<[1], [0], [0], [1], [0, 0, 1, 1], [], []>} : vector<8x36xbf16>, vector<36x100xbf16>, vector<8x100xf32> -> vector<8x100xf32>
    %12 = arith.addf %2, %11 : vector<8x100xf32>
    %13 = vector.extract_strided_slice %0 {offsets = [0, 1], sizes = [8, 1], strides = [1, 1]} : vector<8x18xi32> to vector<8x1xi32>
    %14 = vector.broadcast %13 : vector<8x1xi32> to vector<8x36xi32>
    %15 = arith.cmpi eq, %14, %1 : vector<8x36xi32>
    %16 = arith.extui %15 : vector<8x36xi1> to vector<8x36xi32>
    %17 = arith.sitofp %16 : vector<8x36xi32> to vector<8x36xf32>
    %18 = arith.truncf %17 : vector<8x36xf32> to vector<8x36xbf16>
    %c1 = arith.constant 1 : index
    %c0_5 = arith.constant 0 : index
    %c0_6 = arith.constant 0 : index
    %19 = vector.load %arg2[%c1, %c0_5, %c0_6] : memref<18x36x100xbf16, #tpu.memory_space<vmem>>, vector<1x36x100xbf16>
    %20 = vector.shape_cast %19 : vector<1x36x100xbf16> to vector<36x100xbf16>
    %cst_7 = arith.constant dense<0.000000e+00> : vector<8x100xf32>
    %21 = tpu.matmul %18, %20, %cst_7 {dimension_numbers = #tpu.dot_dimension_numbers<[1], [0], [0], [1], [0, 0, 1, 1], [], []>} : vector<8x36xbf16>, vector<36x100xbf16>, vector<8x100xf32> -> vector<8x100xf32>
    %22 = arith.addf %12, %21 : vector<8x100xf32>
    %23 = vector.extract_strided_slice %0 {offsets = [0, 2], sizes = [8, 1], strides = [1, 1]} : vector<8x18xi32> to vector<8x1xi32>
    %24 = vector.broadcast %23 : vector<8x1xi32> to vector<8x36xi32>
    %25 = arith.cmpi eq, %24, %1 : vector<8x36xi32>
    %26 = arith.extui %25 : vector<8x36xi1> to vector<8x36xi32>
    %27 = arith.sitofp %26 : vector<8x36xi32> to vector<8x36xf32>
    %28 = arith.truncf %27 : vector<8x36xf32> to vector<8x36xbf16>
    %c2 = arith.constant 2 : index
    %c0_8 = arith.constant 0 : index
    %c0_9 = arith.constant 0 : index
    %29 = vector.load %arg2[%c2, %c0_8, %c0_9] : memref<18x36x100xbf16, #tpu.memory_space<vmem>>, vector<1x36x100xbf16>
    %30 = vector.shape_cast %29 : vector<1x36x100xbf16> to vector<36x100xbf16>
    %cst_10 = arith.constant dense<0.000000e+00> : vector<8x100xf32>
    %31 = tpu.matmul %28, %30, %cst_10 {dimension_numbers = #tpu.dot_dimension_numbers<[1], [0], [0], [1], [0, 0, 1, 1], [], []>} : vector<8x36xbf16>, vector<36x100xbf16>, vector<8x100xf32> -> vector<8x100xf32>
    %32 = arith.addf %22, %31 : vector<8x100xf32>
    %33 = vector.extract_strided_slice %0 {offsets = [0, 3], sizes = [8, 1], strides = [1, 1]} : vector<8x18xi32> to vector<8x1xi32>
    %34 = vector.broadcast %33 : vector<8x1xi32> to vector<8x36xi32>
    %35 = arith.cmpi eq, %34, %1 : vector<8x36xi32>
    %36 = arith.extui %35 : vector<8x36xi1> to vector<8x36xi32>
    %37 = arith.sitofp %36 : vector<8x36xi32> to vector<8x36xf32>
    %38 = arith.truncf %37 : vector<8x36xf32> to vector<8x36xbf16>
    %c3 = arith.constant 3 : index
    %c0_11 = arith.constant 0 : index
    %c0_12 = arith.constant 0 : index
    %39 = vector.load %arg2[%c3, %c0_11, %c0_12] : memref<18x36x100xbf16, #tpu.memory_space<vmem>>, vector<1x36x100xbf16>
    %40 = vector.shape_cast %39 : vector<1x36x100xbf16> to vector<36x100xbf16>
    %cst_13 = arith.constant dense<0.000000e+00> : vector<8x100xf32>
    %41 = tpu.matmul %38, %40, %cst_13 {dimension_numbers = #tpu.dot_dimension_numbers<[1], [0], [0], [1], [0, 0, 1, 1], [], []>} : vector<8x36xbf16>, vector<36x100xbf16>, vector<8x100xf32> -> vector<8x100xf32>
    %42 = arith.addf %32, %41 : vector<8x100xf32>
    %43 = vector.extract_strided_slice %0 {offsets = [0, 4], sizes = [8, 1], strides = [1, 1]} : vector<8x18xi32> to vector<8x1xi32>
    %44 = vector.broadcast %43 : vector<8x1xi32> to vector<8x36xi32>
    %45 = arith.cmpi eq, %44, %1 : vector<8x36xi32>
    %46 = arith.extui %45 : vector<8x36xi1> to vector<8x36xi32>
    %47 = arith.sitofp %46 : vector<8x36xi32> to vector<8x36xf32>
    %48 = arith.truncf %47 : vector<8x36xf32> to vector<8x36xbf16>
    %c4 = arith.constant 4 : index
    %c0_14 = arith.constant 0 : index
    %c0_15 = arith.constant 0 : index
    %49 = vector.load %arg2[%c4, %c0_14, %c0_15] : memref<18x36x100xbf16, #tpu.memory_space<vmem>>, vector<1x36x100xbf16>
    %50 = vector.shape_cast %49 : vector<1x36x100xbf16> to vector<36x100xbf16>
    %cst_16 = arith.constant dense<0.000000e+00> : vector<8x100xf32>
    %51 = tpu.matmul %48, %50, %cst_16 {dimension_numbers = #tpu.dot_dimension_numbers<[1], [0], [0], [1], [0, 0, 1, 1], [], []>} : vector<8x36xbf16>, vector<36x100xbf16>, vector<8x100xf32> -> vector<8x100xf32>
    %52 = arith.addf %42, %51 : vector<8x100xf32>
    %53 = vector.extract_strided_slice %0 {offsets = [0, 5], sizes = [8, 1], strides = [1, 1]} : vector<8x18xi32> to vector<8x1xi32>
    %54 = vector.broadcast %53 : vector<8x1xi32> to vector<8x36xi32>
    %55 = arith.cmpi eq, %54, %1 : vector<8x36xi32>
    %56 = arith.extui %55 : vector<8x36xi1> to vector<8x36xi32>
    %57 = arith.sitofp %56 : vector<8x36xi32> to vector<8x36xf32>
    %58 = arith.truncf %57 : vector<8x36xf32> to vector<8x36xbf16>
    %c5 = arith.constant 5 : index
    %c0_17 = arith.constant 0 : index
    %c0_18 = arith.constant 0 : index
    %59 = vector.load %arg2[%c5, %c0_17, %c0_18] : memref<18x36x100xbf16, #tpu.memory_space<vmem>>, vector<1x36x100xbf16>
    %60 = vector.shape_cast %59 : vector<1x36x100xbf16> to vector<36x100xbf16>
    %cst_19 = arith.constant dense<0.000000e+00> : vector<8x100xf32>
    %61 = tpu.matmul %58, %60, %cst_19 {dimension_numbers = #tpu.dot_dimension_numbers<[1], [0], [0], [1], [0, 0, 1, 1], [], []>} : vector<8x36xbf16>, vector<36x100xbf16>, vector<8x100xf32> -> vector<8x100xf32>
    %62 = arith.addf %52, %61 : vector<8x100xf32>
    %63 = vector.extract_strided_slice %0 {offsets = [0, 6], sizes = [8, 1], strides = [1, 1]} : vector<8x18xi32> to vector<8x1xi32>
    %64 = vector.broadcast %63 : vector<8x1xi32> to vector<8x36xi32>
    %65 = arith.cmpi eq, %64, %1 : vector<8x36xi32>
    %66 = arith.extui %65 : vector<8x36xi1> to vector<8x36xi32>
    %67 = arith.sitofp %66 : vector<8x36xi32> to vector<8x36xf32>
    %68 = arith.truncf %67 : vector<8x36xf32> to vector<8x36xbf16>
    %c6 = arith.constant 6 : index
    %c0_20 = arith.constant 0 : index
    %c0_21 = arith.constant 0 : index
    %69 = vector.load %arg2[%c6, %c0_20, %c0_21] : memref<18x36x100xbf16, #tpu.memory_space<vmem>>, vector<1x36x100xbf16>
    %70 = vector.shape_cast %69 : vector<1x36x100xbf16> to vector<36x100xbf16>
    %cst_22 = arith.constant dense<0.000000e+00> : vector<8x100xf32>
    %71 = tpu.matmul %68, %70, %cst_22 {dimension_numbers = #tpu.dot_dimension_numbers<[1], [0], [0], [1], [0, 0, 1, 1], [], []>} : vector<8x36xbf16>, vector<36x100xbf16>, vector<8x100xf32> -> vector<8x100xf32>
    %72 = arith.addf %62, %71 : vector<8x100xf32>
    %73 = vector.extract_strided_slice %0 {offsets = [0, 7], sizes = [8, 1], strides = [1, 1]} : vector<8x18xi32> to vector<8x1xi32>
    %74 = vector.broadcast %73 : vector<8x1xi32> to vector<8x36xi32>
    %75 = arith.cmpi eq, %74, %1 : vector<8x36xi32>
    %76 = arith.extui %75 : vector<8x36xi1> to vector<8x36xi32>
    %77 = arith.sitofp %76 : vector<8x36xi32> to vector<8x36xf32>
    %78 = arith.truncf %77 : vector<8x36xf32> to vector<8x36xbf16>
    %c7 = arith.constant 7 : index
    %c0_23 = arith.constant 0 : index
    %c0_24 = arith.constant 0 : index
    %79 = vector.load %arg2[%c7, %c0_23, %c0_24] : memref<18x36x100xbf16, #tpu.memory_space<vmem>>, vector<1x36x100xbf16>
    %80 = vector.shape_cast %79 : vector<1x36x100xbf16> to vector<36x100xbf16>
    %cst_25 = arith.constant dense<0.000000e+00> : vector<8x100xf32>
    %81 = tpu.matmul %78, %80, %cst_25 {dimension_numbers = #tpu.dot_dimension_numbers<[1], [0], [0], [1], [0, 0, 1, 1], [], []>} : vector<8x36xbf16>, vector<36x100xbf16>, vector<8x100xf32> -> vector<8x100xf32>
    %82 = arith.addf %72, %81 : vector<8x100xf32>
    %83 = vector.extract_strided_slice %0 {offsets = [0, 8], sizes = [8, 1], strides = [1, 1]} : vector<8x18xi32> to vector<8x1xi32>
    %84 = vector.broadcast %83 : vector<8x1xi32> to vector<8x36xi32>
    %85 = arith.cmpi eq, %84, %1 : vector<8x36xi32>
    %86 = arith.extui %85 : vector<8x36xi1> to vector<8x36xi32>
    %87 = arith.sitofp %86 : vector<8x36xi32> to vector<8x36xf32>
    %88 = arith.truncf %87 : vector<8x36xf32> to vector<8x36xbf16>
    %c8 = arith.constant 8 : index
    %c0_26 = arith.constant 0 : index
    %c0_27 = arith.constant 0 : index
    %89 = vector.load %arg2[%c8, %c0_26, %c0_27] : memref<18x36x100xbf16, #tpu.memory_space<vmem>>, vector<1x36x100xbf16>
    %90 = vector.shape_cast %89 : vector<1x36x100xbf16> to vector<36x100xbf16>
    %cst_28 = arith.constant dense<0.000000e+00> : vector<8x100xf32>
    %91 = tpu.matmul %88, %90, %cst_28 {dimension_numbers = #tpu.dot_dimension_numbers<[1], [0], [0], [1], [0, 0, 1, 1], [], []>} : vector<8x36xbf16>, vector<36x100xbf16>, vector<8x100xf32> -> vector<8x100xf32>
    %92 = arith.addf %82, %91 : vector<8x100xf32>
    %93 = vector.extract_strided_slice %0 {offsets = [0, 9], sizes = [8, 1], strides = [1, 1]} : vector<8x18xi32> to vector<8x1xi32>
    %94 = vector.broadcast %93 : vector<8x1xi32> to vector<8x36xi32>
    %95 = arith.cmpi eq, %94, %1 : vector<8x36xi32>
    %96 = arith.extui %95 : vector<8x36xi1> to vector<8x36xi32>
    %97 = arith.sitofp %96 : vector<8x36xi32> to vector<8x36xf32>
    %98 = arith.truncf %97 : vector<8x36xf32> to vector<8x36xbf16>
    %c9 = arith.constant 9 : index
    %c0_29 = arith.constant 0 : index
    %c0_30 = arith.constant 0 : index
    %99 = vector.load %arg2[%c9, %c0_29, %c0_30] : memref<18x36x100xbf16, #tpu.memory_space<vmem>>, vector<1x36x100xbf16>
    %100 = vector.shape_cast %99 : vector<1x36x100xbf16> to vector<36x100xbf16>
    %cst_31 = arith.constant dense<0.000000e+00> : vector<8x100xf32>
    %101 = tpu.matmul %98, %100, %cst_31 {dimension_numbers = #tpu.dot_dimension_numbers<[1], [0], [0], [1], [0, 0, 1, 1], [], []>} : vector<8x36xbf16>, vector<36x100xbf16>, vector<8x100xf32> -> vector<8x100xf32>
    %102 = arith.addf %92, %101 : vector<8x100xf32>
    %103 = vector.extract_strided_slice %0 {offsets = [0, 10], sizes = [8, 1], strides = [1, 1]} : vector<8x18xi32> to vector<8x1xi32>
    %104 = vector.broadcast %103 : vector<8x1xi32> to vector<8x36xi32>
    %105 = arith.cmpi eq, %104, %1 : vector<8x36xi32>
    %106 = arith.extui %105 : vector<8x36xi1> to vector<8x36xi32>
    %107 = arith.sitofp %106 : vector<8x36xi32> to vector<8x36xf32>
    %108 = arith.truncf %107 : vector<8x36xf32> to vector<8x36xbf16>
    %c10 = arith.constant 10 : index
    %c0_32 = arith.constant 0 : index
    %c0_33 = arith.constant 0 : index
    %109 = vector.load %arg2[%c10, %c0_32, %c0_33] : memref<18x36x100xbf16, #tpu.memory_space<vmem>>, vector<1x36x100xbf16>
    %110 = vector.shape_cast %109 : vector<1x36x100xbf16> to vector<36x100xbf16>
    %cst_34 = arith.constant dense<0.000000e+00> : vector<8x100xf32>
    %111 = tpu.matmul %108, %110, %cst_34 {dimension_numbers = #tpu.dot_dimension_numbers<[1], [0], [0], [1], [0, 0, 1, 1], [], []>} : vector<8x36xbf16>, vector<36x100xbf16>, vector<8x100xf32> -> vector<8x100xf32>
    %112 = arith.addf %102, %111 : vector<8x100xf32>
    %113 = vector.extract_strided_slice %0 {offsets = [0, 11], sizes = [8, 1], strides = [1, 1]} : vector<8x18xi32> to vector<8x1xi32>
    %114 = vector.broadcast %113 : vector<8x1xi32> to vector<8x36xi32>
    %115 = arith.cmpi eq, %114, %1 : vector<8x36xi32>
    %116 = arith.extui %115 : vector<8x36xi1> to vector<8x36xi32>
    %117 = arith.sitofp %116 : vector<8x36xi32> to vector<8x36xf32>
    %118 = arith.truncf %117 : vector<8x36xf32> to vector<8x36xbf16>
    %c11 = arith.constant 11 : index
    %c0_35 = arith.constant 0 : index
    %c0_36 = arith.constant 0 : index
    %119 = vector.load %arg2[%c11, %c0_35, %c0_36] : memref<18x36x100xbf16, #tpu.memory_space<vmem>>, vector<1x36x100xbf16>
    %120 = vector.shape_cast %119 : vector<1x36x100xbf16> to vector<36x100xbf16>
    %cst_37 = arith.constant dense<0.000000e+00> : vector<8x100xf32>
    %121 = tpu.matmul %118, %120, %cst_37 {dimension_numbers = #tpu.dot_dimension_numbers<[1], [0], [0], [1], [0, 0, 1, 1], [], []>} : vector<8x36xbf16>, vector<36x100xbf16>, vector<8x100xf32> -> vector<8x100xf32>
    %122 = arith.addf %112, %121 : vector<8x100xf32>
    %123 = vector.extract_strided_slice %0 {offsets = [0, 12], sizes = [8, 1], strides = [1, 1]} : vector<8x18xi32> to vector<8x1xi32>
    %124 = vector.broadcast %123 : vector<8x1xi32> to vector<8x36xi32>
    %125 = arith.cmpi eq, %124, %1 : vector<8x36xi32>
    %126 = arith.extui %125 : vector<8x36xi1> to vector<8x36xi32>
    %127 = arith.sitofp %126 : vector<8x36xi32> to vector<8x36xf32>
    %128 = arith.truncf %127 : vector<8x36xf32> to vector<8x36xbf16>
    %c12 = arith.constant 12 : index
    %c0_38 = arith.constant 0 : index
    %c0_39 = arith.constant 0 : index
    %129 = vector.load %arg2[%c12, %c0_38, %c0_39] : memref<18x36x100xbf16, #tpu.memory_space<vmem>>, vector<1x36x100xbf16>
    %130 = vector.shape_cast %129 : vector<1x36x100xbf16> to vector<36x100xbf16>
    %cst_40 = arith.constant dense<0.000000e+00> : vector<8x100xf32>
    %131 = tpu.matmul %128, %130, %cst_40 {dimension_numbers = #tpu.dot_dimension_numbers<[1], [0], [0], [1], [0, 0, 1, 1], [], []>} : vector<8x36xbf16>, vector<36x100xbf16>, vector<8x100xf32> -> vector<8x100xf32>
    %132 = arith.addf %122, %131 : vector<8x100xf32>
    %133 = vector.extract_strided_slice %0 {offsets = [0, 13], sizes = [8, 1], strides = [1, 1]} : vector<8x18xi32> to vector<8x1xi32>
    %134 = vector.broadcast %133 : vector<8x1xi32> to vector<8x36xi32>
    %135 = arith.cmpi eq, %134, %1 : vector<8x36xi32>
    %136 = arith.extui %135 : vector<8x36xi1> to vector<8x36xi32>
    %137 = arith.sitofp %136 : vector<8x36xi32> to vector<8x36xf32>
    %138 = arith.truncf %137 : vector<8x36xf32> to vector<8x36xbf16>
    %c13 = arith.constant 13 : index
    %c0_41 = arith.constant 0 : index
    %c0_42 = arith.constant 0 : index
    %139 = vector.load %arg2[%c13, %c0_41, %c0_42] : memref<18x36x100xbf16, #tpu.memory_space<vmem>>, vector<1x36x100xbf16>
    %140 = vector.shape_cast %139 : vector<1x36x100xbf16> to vector<36x100xbf16>
    %cst_43 = arith.constant dense<0.000000e+00> : vector<8x100xf32>
    %141 = tpu.matmul %138, %140, %cst_43 {dimension_numbers = #tpu.dot_dimension_numbers<[1], [0], [0], [1], [0, 0, 1, 1], [], []>} : vector<8x36xbf16>, vector<36x100xbf16>, vector<8x100xf32> -> vector<8x100xf32>
    %142 = arith.addf %132, %141 : vector<8x100xf32>
    %143 = vector.extract_strided_slice %0 {offsets = [0, 14], sizes = [8, 1], strides = [1, 1]} : vector<8x18xi32> to vector<8x1xi32>
    %144 = vector.broadcast %143 : vector<8x1xi32> to vector<8x36xi32>
    %145 = arith.cmpi eq, %144, %1 : vector<8x36xi32>
    %146 = arith.extui %145 : vector<8x36xi1> to vector<8x36xi32>
    %147 = arith.sitofp %146 : vector<8x36xi32> to vector<8x36xf32>
    %148 = arith.truncf %147 : vector<8x36xf32> to vector<8x36xbf16>
    %c14 = arith.constant 14 : index
    %c0_44 = arith.constant 0 : index
    %c0_45 = arith.constant 0 : index
    %149 = vector.load %arg2[%c14, %c0_44, %c0_45] : memref<18x36x100xbf16, #tpu.memory_space<vmem>>, vector<1x36x100xbf16>
    %150 = vector.shape_cast %149 : vector<1x36x100xbf16> to vector<36x100xbf16>
    %cst_46 = arith.constant dense<0.000000e+00> : vector<8x100xf32>
    %151 = tpu.matmul %148, %150, %cst_46 {dimension_numbers = #tpu.dot_dimension_numbers<[1], [0], [0], [1], [0, 0, 1, 1], [], []>} : vector<8x36xbf16>, vector<36x100xbf16>, vector<8x100xf32> -> vector<8x100xf32>
    %152 = arith.addf %142, %151 : vector<8x100xf32>
    %153 = vector.extract_strided_slice %0 {offsets = [0, 15], sizes = [8, 1], strides = [1, 1]} : vector<8x18xi32> to vector<8x1xi32>
    %154 = vector.broadcast %153 : vector<8x1xi32> to vector<8x36xi32>
    %155 = arith.cmpi eq, %154, %1 : vector<8x36xi32>
    %156 = arith.extui %155 : vector<8x36xi1> to vector<8x36xi32>
    %157 = arith.sitofp %156 : vector<8x36xi32> to vector<8x36xf32>
    %158 = arith.truncf %157 : vector<8x36xf32> to vector<8x36xbf16>
    %c15 = arith.constant 15 : index
    %c0_47 = arith.constant 0 : index
    %c0_48 = arith.constant 0 : index
    %159 = vector.load %arg2[%c15, %c0_47, %c0_48] : memref<18x36x100xbf16, #tpu.memory_space<vmem>>, vector<1x36x100xbf16>
    %160 = vector.shape_cast %159 : vector<1x36x100xbf16> to vector<36x100xbf16>
    %cst_49 = arith.constant dense<0.000000e+00> : vector<8x100xf32>
    %161 = tpu.matmul %158, %160, %cst_49 {dimension_numbers = #tpu.dot_dimension_numbers<[1], [0], [0], [1], [0, 0, 1, 1], [], []>} : vector<8x36xbf16>, vector<36x100xbf16>, vector<8x100xf32> -> vector<8x100xf32>
    %162 = arith.addf %152, %161 : vector<8x100xf32>
    %163 = vector.extract_strided_slice %0 {offsets = [0, 16], sizes = [8, 1], strides = [1, 1]} : vector<8x18xi32> to vector<8x1xi32>
    %164 = vector.broadcast %163 : vector<8x1xi32> to vector<8x36xi32>
    %165 = arith.cmpi eq, %164, %1 : vector<8x36xi32>
    %166 = arith.extui %165 : vector<8x36xi1> to vector<8x36xi32>
    %167 = arith.sitofp %166 : vector<8x36xi32> to vector<8x36xf32>
    %168 = arith.truncf %167 : vector<8x36xf32> to vector<8x36xbf16>
    %c16 = arith.constant 16 : index
    %c0_50 = arith.constant 0 : index
    %c0_51 = arith.constant 0 : index
    %169 = vector.load %arg2[%c16, %c0_50, %c0_51] : memref<18x36x100xbf16, #tpu.memory_space<vmem>>, vector<1x36x100xbf16>
    %170 = vector.shape_cast %169 : vector<1x36x100xbf16> to vector<36x100xbf16>
    %cst_52 = arith.constant dense<0.000000e+00> : vector<8x100xf32>
    %171 = tpu.matmul %168, %170, %cst_52 {dimension_numbers = #tpu.dot_dimension_numbers<[1], [0], [0], [1], [0, 0, 1, 1], [], []>} : vector<8x36xbf16>, vector<36x100xbf16>, vector<8x100xf32> -> vector<8x100xf32>
    %172 = arith.addf %162, %171 : vector<8x100xf32>
    %173 = vector.extract_strided_slice %0 {offsets = [0, 17], sizes = [8, 1], strides = [1, 1]} : vector<8x18xi32> to vector<8x1xi32>
    %174 = vector.broadcast %173 : vector<8x1xi32> to vector<8x36xi32>
    %175 = arith.cmpi eq, %174, %1 : vector<8x36xi32>
    %176 = arith.extui %175 : vector<8x36xi1> to vector<8x36xi32>
    %177 = arith.sitofp %176 : vector<8x36xi32> to vector<8x36xf32>
    %178 = arith.truncf %177 : vector<8x36xf32> to vector<8x36xbf16>
    %c17 = arith.constant 17 : index
    %c0_53 = arith.constant 0 : index
    %c0_54 = arith.constant 0 : index
    %179 = vector.load %arg2[%c17, %c0_53, %c0_54] : memref<18x36x100xbf16, #tpu.memory_space<vmem>>, vector<1x36x100xbf16>
    %180 = vector.shape_cast %179 : vector<1x36x100xbf16> to vector<36x100xbf16>
    %cst_55 = arith.constant dense<0.000000e+00> : vector<8x100xf32>
    %181 = tpu.matmul %178, %180, %cst_55 {dimension_numbers = #tpu.dot_dimension_numbers<[1], [0], [0], [1], [0, 0, 1, 1], [], []>} : vector<8x36xbf16>, vector<36x100xbf16>, vector<8x100xf32> -> vector<8x100xf32>
    %182 = arith.addf %172, %181 : vector<8x100xf32>
    %c0_56 = arith.constant 0 : index
    %c0_57 = arith.constant 0 : index
    %183 = vector.load %arg3[%c0_56, %c0_57] : memref<1x100xf32, #tpu.memory_space<vmem>>, vector<1x100xf32>
    %184 = vector.broadcast %183 : vector<1x100xf32> to vector<8x100xf32>
    %185 = arith.addf %182, %184 : vector<8x100xf32>
    %186 = math.tanh %185 : vector<8x100xf32>
    %187 = arith.truncf %186 : vector<8x100xf32> to vector<8x100xbf16>
    %c0_58 = arith.constant 0 : index
    %c0_59 = arith.constant 0 : index
    %188 = vector.load %arg4[%c0_58, %c0_59] : memref<100x100xbf16, #tpu.memory_space<vmem>>, vector<100x100xbf16>
    %cst_60 = arith.constant dense<0.000000e+00> : vector<8x100xf32>
    %189 = tpu.matmul %187, %188, %cst_60 {dimension_numbers = #tpu.dot_dimension_numbers<[1], [0], [0], [1], [0, 0, 1, 1], [], []>} : vector<8x100xbf16>, vector<100x100xbf16>, vector<8x100xf32> -> vector<8x100xf32>
    %c0_61 = arith.constant 0 : index
    %c0_62 = arith.constant 0 : index
    %190 = vector.load %arg5[%c0_61, %c0_62] : memref<1x100xf32, #tpu.memory_space<vmem>>, vector<1x100xf32>
    %191 = vector.broadcast %190 : vector<1x100xf32> to vector<8x100xf32>
    %192 = arith.addf %189, %191 : vector<8x100xf32>
    %193 = math.tanh %192 : vector<8x100xf32>
    %194 = arith.truncf %193 : vector<8x100xf32> to vector<8x100xbf16>
    %c0_63 = arith.constant 0 : index
    %c0_64 = arith.constant 0 : index
    %195 = vector.load %arg6[%c0_63, %c0_64] : memref<100x18xbf16, #tpu.memory_space<vmem>>, vector<100x18xbf16>
    %cst_65 = arith.constant dense<0.000000e+00> : vector<8x18xf32>
    %196 = tpu.matmul %194, %195, %cst_65 {dimension_numbers = #tpu.dot_dimension_numbers<[1], [0], [0], [1], [0, 0, 1, 1], [], []>} : vector<8x100xbf16>, vector<100x18xbf16>, vector<8x18xf32> -> vector<8x18xf32>
    %c0_66 = arith.constant 0 : index
    %c0_67 = arith.constant 0 : index
    %197 = vector.load %arg7[%c0_66, %c0_67] : memref<1x18xf32, #tpu.memory_space<vmem>>, vector<1x18xf32>
    %198 = vector.broadcast %197 : vector<1x18xf32> to vector<8x18xf32>
    %199 = arith.addf %196, %198 : vector<8x18xf32>
    %200 = math.tanh %199 : vector<8x18xf32>
    %c0_68 = arith.constant 0 : index
    %c0_69 = arith.constant 0 : index
    %201 = vector.load %arg8[%c0_68, %c0_69] : memref<8x18xf32, #tpu.memory_space<vmem>>, vector<8x18xf32>
    tpu.vector_store %arg8[%c0_68, %c0_69], %200 {strides = array<i32>} : memref<8x18xf32, #tpu.memory_space<vmem>>, vector<8x18xf32>,
    return
  }
  func.func @transform_0(%arg0: i32) -> (i32, i32) {
    %c0_i32 = arith.constant 0 : i32
    %c0_i32_0 = arith.constant 0 : i32
    return %arg0, %c0_i32 : i32, i32
  }
  func.func @transform_1(%arg0: i32) -> (i32, i32, i32) {
    %c0_i32 = arith.constant 0 : i32
    %c0_i32_0 = arith.constant 0 : i32
    %c0_i32_1 = arith.constant 0 : i32
    %c0_i32_2 = arith.constant 0 : i32
    return %c0_i32, %c0_i32_0, %c0_i32_1 : i32, i32, i32
  }
  func.func @transform_2(%arg0: i32) -> (i32, i32) {
    %c0_i32 = arith.constant 0 : i32
    %c0_i32_0 = arith.constant 0 : i32
    %c0_i32_1 = arith.constant 0 : i32
    return %c0_i32, %c0_i32_0 : i32, i32
  }
  func.func @transform_3(%arg0: i32) -> (i32, i32) {
    %c0_i32 = arith.constant 0 : i32
    %c0_i32_0 = arith.constant 0 : i32
    %c0_i32_1 = arith.constant 0 : i32
    return %c0_i32, %c0_i32_0 : i32, i32
  }
  func.func @transform_4(%arg0: i32) -> (i32, i32) {
    %c0_i32 = arith.constant 0 : i32
    %c0_i32_0 = arith.constant 0 : i32
    %c0_i32_1 = arith.constant 0 : i32
    return %c0_i32, %c0_i32_0 : i32, i32
  }
  func.func @transform_5(%arg0: i32) -> (i32, i32) {
    %c0_i32 = arith.constant 0 : i32
    %c0_i32_0 = arith.constant 0 : i32
    %c0_i32_1 = arith.constant 0 : i32
    return %c0_i32, %c0_i32_0 : i32, i32
  }
  func.func @transform_6(%arg0: i32) -> (i32, i32) {
    %c0_i32 = arith.constant 0 : i32
    %c0_i32_0 = arith.constant 0 : i32
    %c0_i32_1 = arith.constant 0 : i32
    return %c0_i32, %c0_i32_0 : i32, i32
  }
  func.func @transform_7(%arg0: i32) -> (i32, i32) {
    %c0_i32 = arith.constant 0 : i32
    %c0_i32_0 = arith.constant 0 : i32
    return %arg0, %c0_i32 : i32, i32
  }
}

</mosaic_0001>

<bundles_post_ra>
// kernel: generator_forward.1
= control target key start
LH: loop header
LB: loop body
LE: loop exit
PB: predicated region body
PF: predicated region fallthrough
CT: control target
= control target key end

     0   :  { %v1510_v1 = vmov 2   ;;  %v1511_v2 = vmov 1   ;;  %v1512_v3 = vmov 4   ;;  %s1890_s0 = inlined_call_operand.vmem [shape: s32[8,18], index: 0, kind: input, shape index: {}]   ;;  %s1891_s1 = inlined_call_operand.vmem [shape: bf16[18,36,100], index: 1, kind: input, shape index: {}]   ;;  %s1892_s2 = inlined_call_operand.vmem [shape: f32[1,100], index: 2, kind: input, shape index: {}]   ;;  %s1893_s3 = inlined_call_operand.vmem [shape: bf16[100,100], index: 3, kind: input, shape index: {}]   ;;  %s1894_s4 = inlined_call_operand.vmem [shape: f32[1,100], index: 4, kind: input, shape index: {}]   ;;  %s1895_s5 = inlined_call_operand.vmem [shape: bf16[100,18], index: 5, kind: input, shape index: {}]   ;;  %s1896_s6 = inlined_call_operand.vmem [shape: f32[1,18], index: 6, kind: input, shape index: {}]   ;;  %s1897_s7 = inlined_call_operand.hbm [shape: f32[8,18], index: 7, kind: output, shape index: {}]  }
   0x1   :  { %v1573_v0 = vld [vmem:[%s1890_s0] sm:$0xff]  ;;  %1458 = vset.pattern.permute.xlu1 %v1510_v1  ;;  %1456 = vset.pattern.permute.xlu0 %v1511_v2 }
   0x2   :  { %127 = vperm.xlu1 %1458, %v1573_v0   ;;  %44 = vperm.xlu0 %1456, %v1573_v0  }
   0x3   :  { %1460 = vset.pattern.permute.xlu2 %v1512_v3 }
   0x4   :  { %12 = vsyncpa [#allocation3], 0  ;;  %223 = vperm.xlu2 %1460, %v1573_v0   ;;  %v1513_v4 = vmov 3   ;;  %v1514_v5 = vmov 0   ;;  %v1515_v6 = vmov 5   ;;  %v1516_v7 = vmov 6  }
   0x5   :  { %v1517_v8 = vmov 8   ;;  %v1518_v9 = vmov 7   ;;  %v1079_v10 = vld [vmem:[%s1891_s1 + $0x24] sm:$0x3]  ;;  %v1103_v11 = vld [vmem:[%s1891_s1 + $0x38] sm:$0x3] }
   0x6   :  { %v65_v12 = vunpack.c.l.b16 %v1079_v10  ;;  %v148_v13 = vunpack.c.l.b16 %v1103_v11  ;;  %v1519_v14 = vmov 9   ;;  %v1520_v15 = vmov 13   ;;  %v1391_v21 = vld [vmem:[%s1891_s1 + $0x1c] sm:$0xff]  ;;  %v1393_v22 = vld [vmem:[%s1891_s1 + $0x30] sm:$0xff]  ;;  %v1118_v30 = vld [vmem:[%s1891_s1 + $0x4c] sm:$0x3] }
   0x7   :  { %vm75_vm0 = vcmask 1041408   ;;  %v1521_v18 = vmov 10   ;;  %v1522_v23 = vmov 11   ;;  %v1523_v24 = vmov 17   ;;  %v42_v29 = vld [vmem:[%s1891_s1 + $0x10] sm:$0x3] }
   0x8   :  { %v68_v16 = vpack.c.b16 %v65_v12, %v65_v12  ;;  %v151_v17 = vpack.c.b16 %v148_v13, %v148_v13  ;;  %v1524_v25 = vmov 12   ;;  %v1525_v26 = vmov 14   ;;  %v1390_v33 = vld [vmem:[%s1891_s1 + $0x14] sm:$0xff]  ;;  %v1392_v34 = vld [vmem:[%s1891_s1 + $0x28] sm:$0xff]  ;;  %v1133_v39 = vld [vmem:[%s1891_s1 + $0x60] sm:$0x3] }
   0x9   :  { %v1526_v27 = vmov 15   ;;  %v1527_v28 = vmov 16   ;;  %v101_v31 = vunpack.c.l.b16 %v42_v29  ;;  %v196_v32 = vunpack.c.l.b16 %v1118_v30  ;;  %v1389_v40 = vld [vmem:[%s1891_s1 + $0x8] sm:$0xff]  ;;  %v1388_v45 = vld [vmem:[%s1891_s1] sm:$0xff]  ;;  %v1397_v49 = vld [vmem:[%s1891_s1 + $0x58] sm:$0xff] }
   0xa   :  { %1459 = vset.pattern.permute.xlu1 %v1513_v4  ;;  %1457 = vset.pattern.permute.xlu0 %v1514_v5  ;;  %v77_v19 = vsel %vm75_vm0, %v68_v16, 0  ;;  %v158_v20 = vsel %vm75_vm0, %v151_v17, 0  ;;  %v1395_v41 = vld [vmem:[%s1891_s1 + $0x44] sm:$0xff]  ;;  %v244_v42 = vunpack.c.l.b16 %v1133_v39  ;;  %v1394_v46 = vld [vmem:[%s1891_s1 + $0x3c] sm:$0xff]  ;;  %v1148_v51 = vld [vmem:[%s1891_s1 + $0x74] sm:$0x3]  ;;  %v29_v4 = vlaneseq }
   0xb   :  { %175 = vperm.xlu1 %1459, %v1573_v0   ;;  %32 = vperm.xlu0 %1457, %v1573_v0   ;;  %v104_v35 = vpack.c.b16 %v101_v31, %v101_v31  ;;  %v199_v36 = vpack.c.b16 %v196_v32, %v196_v32  ;;  %v1163_v47 = vld [vmem:[%s1891_s1 + $0x88] sm:$0x3]  ;;  %v1178_v52 = vld [vmem:[%s1891_s1 + $0x9c] sm:$0x3]  ;;  %v292_v53 = vunpack.c.l.b16 %v1148_v51  ;;  %v1396_v55 = vld [vmem:[%s1891_s1 + $0x50] sm:$0xff]  ;;  %vm71_vm3 = vcmask 293888  }
   0xc   :  { %1461 = vset.pattern.permute.xlu2 %v1515_v6  ;;  %84 = vmatpush.bf16.msra.mxu0 %v77_v19  ;;  %v247_v43 = vpack.c.b16 %v244_v42, %v244_v42  ;;  %v340_v48 = vunpack.c.l.b16 %v1163_v47  ;;  %v388_v56 = vunpack.c.l.b16 %v1178_v52  ;;  %v1401_v57 = vld [vmem:[%s1891_s1 + $0x80] sm:$0xff]  ;;  %v1399_v62 = vld [vmem:[%s1891_s1 + $0x6c] sm:$0xff]  ;;  %v1400_v63 = vld [vmem:[%s1891_s1 + $0x78] sm:$0xff] }
   0xd   :  { %271 = vperm.xlu2 %1461, %v1573_v0   ;;  %165 = vmatpush.bf16.msra.mxu2 %v158_v20  ;;  %v111_v37 = vsel %vm75_vm0, %v104_v35, 0  ;;  %v206_v38 = vsel %vm75_vm0, %v199_v36, 0  ;;  %v295_v58 = vpack.c.b16 %v292_v53, %v292_v53  ;;  %v1398_v1 = vld [vmem:[%s1891_s1 + $0x64] sm:$0xff]  ;;  %v1193_v2 = vld [vmem:[%s1891_s1 + $0xb0] sm:$0x3] }
   0xe   :  { %118 = vmatpush.bf16.msra.mxu1 %v111_v37  ;;  %213 = vmatpush.bf16.msra.mxu3 %v206_v38  ;;  %v254_v44 = vsel %vm75_vm0, %v247_v43, 0  ;;  %v343_v50 = vpack.c.b16 %v340_v48, %v340_v48  ;;  %v391_v59 = vpack.c.b16 %v388_v56, %v388_v56  ;;  %v1402_v3 = vld [vmem:[%s1891_s1 + $0x8c] sm:$0xff]  ;;  %v1223_v5 = vld [vmem:[%s1891_s1 + $0xd8] sm:$0x3]  ;;  %v436_v6 = vunpack.c.l.b16 %v1193_v2  ;;  %v1253_v29 = vld [vmem:[%s1891_s1 + $0x100] sm:$0x3] }
   0xf   :  { %v302_v60 = vsel %vm75_vm0, %v295_v58, 0  ;;  %v1404_v36 = vld [vmem:[%s1891_s1 + $0xa0] sm:$0xff]  ;;  %v628_v37 = vunpack.c.l.b16 %v1253_v29  ;;  %v1298_v52 = vld [vmem:[%s1891_s1 + $0x13c] sm:$0x3] }
  0x10   :  { %85 = vmatpush.bf16.msra.mxu0 %v1391_v21  ;;  %v350_v54 = vsel %vm75_vm0, %v343_v50, 0  ;;  %v398_v61 = vsel %vm75_vm0, %v391_v59, 0  ;;  %v439_v10 = vpack.c.b16 %v436_v6, %v436_v6  ;;  %v1411_v47 = vld [vmem:[%s1891_s1 + $0xe4] sm:$0xff] }
  0x11   :  { %166 = vmatpush.bf16.msra.mxu2 %v1393_v22  ;;  %v1417_v2 = vld [vmem:[%s1891_s1 + $0x120] sm:$0xff] }
  0x12   :  { %119 = vmatpush.bf16.msra.mxu1 %v1389_v40  ;;  %214 = vmatpush.bf16.msra.mxu3 %v1395_v41  ;;  %v446_v21 = vsel %vm75_vm0, %v439_v10, 0  ;;  %v1408_v41 = vld [vmem:[%s1891_s1 + $0xc8] sm:$0xff]  ;;  %v1412_v10 = vld [vmem:[%s1891_s1 + $0xf0] sm:$0xff] }
  0x13   :  { %1462 = vset.pattern.permute.xlu1 %v1516_v7  ;;  %1464 = vset.pattern.permute.xlu0 %v1517_v8  ;;  %v532_v7 = vunpack.c.l.b16 %v1223_v5  ;;  %v1679_v8 = vand.u32 127, %v29_v4 }
  0x14   :  { %319 = vperm.xlu1 %1462, %v1573_v0   ;;  %415 = vperm.xlu0 %1464, %v1573_v0  }
  0x15   :  { %1463 = vset.pattern.permute.xlu2 %v1518_v9  ;;  %86 = vmatpush.bf16.msra.mxu0 %v1390_v33  ;;  %v535_v11 = vpack.c.b16 %v532_v7, %v532_v7  ;;  %v1283_v33 = vld [vmem:[%s1891_s1 + $0x128] sm:$0x3] }
  0x16   :  { %367 = vperm.xlu2 %1463, %v1573_v0   ;;  %167 = vmatpush.bf16.msra.mxu2 %v1392_v34  ;;  %v724_v43 = vunpack.c.l.b16 %v1283_v33 }
  0x17   :  { %120 = vmatpush.bf16.msra.mxu1 %v1388_v45  ;;  %215 = vmatpush.bf16.msra.mxu3 %v1394_v46  ;;  %v542_v22 = vsel %vm75_vm0, %v535_v11, 0  ;;  %v631_v45 = vpack.c.b16 %v628_v37, %v628_v37 }
  0x18   :  { %v727_v50 = vpack.c.b16 %v724_v43, %v724_v43 }
  0x19   :  { %261 = vmatpush.bf16.msrb.mxu0 %v254_v44  ;;  %v1407_v44 = vld [vmem:[%s1891_s1 + $0xbc] sm:$0xff] }
  0x1a   :  { %357 = vmatpush.bf16.msrb.mxu2 %v350_v54  ;;  %v1406_v54 = vld [vmem:[%s1891_s1 + $0xb4] sm:$0xff] }
  0x1b   :  { %309 = vmatpush.bf16.msrb.mxu1 %v302_v60  ;;  %405 = vmatpush.bf16.msrb.mxu3 %v398_v61  ;;  %v734_v60 = vsel %vm75_vm0, %v727_v50, 0  ;;  %v772_v61 = vunpack.c.l.b16 %v1298_v52 }
  0x1c   :  { %1465 = vset.pattern.permute.xlu1 %v1519_v14  ;;  %1469 = vset.pattern.permute.xlu0 %v1520_v15  ;;  %v1208_v14 = vld [vmem:[%s1891_s1 + $0xc4] sm:$0x3]  ;;  %v1528_v15 = vmov 0.0  }
  0x1d   :  { %463 = vperm.xlu1 %1465, %v1573_v0   ;;  %655 = vperm.xlu0 %1469, %v1573_v0   ;;  %v775_v5 = vpack.c.b16 %v772_v61, %v772_v61 }
  0x1e   :  { %1466 = vset.pattern.permute.xlu2 %v1521_v18  ;;  %262 = vmatpush.bf16.msrb.mxu0 %v1397_v49  ;;  %v1238_v18 = vld [vmem:[%s1891_s1 + $0xec] sm:$0x3]  ;;  %v1268_v49 = vld [vmem:[%s1891_s1 + $0x114] sm:$0x3] }
  0x1f   :  { %511 = vperm.xlu2 %1466, %v1573_v0   ;;  %358 = vmatpush.bf16.msrb.mxu2 %v1401_v57  ;;  %v1410_v57 = vld [vmem:[%s1891_s1 + $0xdc] sm:$0xff]  ;;  %v676_v58 = vunpack.c.l.b16 %v1268_v49 }
  0x20   :  { %310 = vmatpush.bf16.msrb.mxu1 %v1399_v62  ;;  %v1413_v62 = vld [vmem:[%s1891_s1 + $0xf8] sm:$0xff] }
  0x22   :  { %263 = vmatpush.bf16.msrb.mxu0 %v1396_v55  ;;  %v638_v55 = vsel %vm75_vm0, %v631_v45, 0 }
  0x23   :  { %359 = vmatpush.bf16.msrb.mxu2 %v1400_v63 }
  0x24   :  { %311 = vmatpush.bf16.msrb.mxu1 %v1398_v1  ;;  %v679_v1 = vpack.c.b16 %v676_v58, %v676_v58 }
  0x25   :  { %1467 = vset.pattern.permute.xlu1 %v1522_v23  ;;  %1474 = vset.pattern.permute.xlu0 %v1523_v24  ;;  %v484_v23 = vunpack.c.l.b16 %v1208_v14  ;;  %v1416_v14 = vld [vmem:[%s1891_s1 + $0x118] sm:$0xff] }
  0x26   :  { %559 = vperm.xlu1 %1467, %v1573_v0  }
  0x27   :  { %1468 = vset.pattern.permute.xlu2 %v1524_v25  ;;  %v1405_v25 = vld [vmem:[%s1891_s1 + $0xa8] sm:$0xff] }
  0x28   :  { %607 = vperm.xlu2 %1468, %v1573_v0  }
  0x2e   :  { %1470 = vset.pattern.permute.xlu1 %v1525_v26  ;;  %v1409_v26 = vld [vmem:[%s1891_s1 + $0xd0] sm:$0xff] }
  0x2f   :  { %703 = vperm.xlu1 %1470, %v1573_v0  }
  0x30   :  { %1471 = vset.pattern.permute.xlu2 %v1526_v27 }
  0x31   :  { %751 = vperm.xlu2 %1471, %v1573_v0  }
  0x37   :  { %1472 = vset.pattern.permute.xlu1 %v1527_v28  ;;  %v487_v28 = vpack.c.b16 %v484_v23, %v484_v23  ;;  %v1328_v23 = vld [vmem:[%s1891_s1 + $0x164] sm:$0x3] }
  0x38   :  { %799 = vperm.xlu1 %1472, %v1573_v0   ;;  %v868_v29 = vunpack.c.l.b16 %v1328_v23 }
  0x39   :  { %1473 = vset.pattern.permute.xlu2 %v1523_v24  ;;  %v580_v24 = vunpack.c.l.b16 %v1238_v18  ;;  %v494_v40 = vsel %vm75_vm0, %v487_v28, 0  ;;  %v1415_v18 = vld [vmem:[%s1891_s1 + $0x10c] sm:$0xff] }
  0x3a   :  { %847 = vperm.xlu2 %1473, %v1573_v0   ;;  %v1403_v0 = vld [vmem:[%s1891_s1 + $0x94] sm:$0xff]  ;;  %v1418_v28 = vld [vmem:[%s1891_s1 + $0x12c] sm:$0xff]  ;;  %v871_v33 = vpack.c.b16 %v868_v29, %v868_v29 }
  0x3b   :  { %406 = vmatpush.bf16.msrb.mxu3 %v1403_v0  ;;  %v583_v32 = vpack.c.b16 %v580_v24, %v580_v24  ;;  %v1425_v29 = vld [vmem:[%s1893_s3 + $0x8] sm:$0xff] }
  0x3d   :  { %v590_v42 = vsel %vm75_vm0, %v583_v32, 0 }
  0x3f   :  { %407 = vmatpush.bf16.msrb.mxu3 %v1402_v3  ;;  %v1313_v3 = vld [vmem:[%s1891_s1 + $0x150] sm:$0x3] }
  0x40   :  { %v820_v11 = vunpack.c.l.b16 %v1313_v3 }
  0x5e   :  { %v224_v9 = vpop.permute.xlu2 %223 }
  0x5f   :  { %vm225_vm6 = vcmp.eq.s32.totalorder %v224_v9, %v1679_v8 }
  0x60   :  { %v1128_v46 = vsel %vm225_vm6, 1.0, %v1528_v15 }
  0x61   :  { %v228_v53 = vpack.c.bf16 %v1128_v46, %v1128_v46 }
  0x67   :  { %v1701_v27 = vpop.permute.xlu2 %271 }
  0x68   :  { %vm273_vm9 = vcmp.eq.s32.totalorder %v1701_v27, %v1679_v8 }
  0x69   :  { %v1143_v4 = vsel %vm273_vm9, 1.0, %v1528_v15 }
  0x70   :  { %v368_v48 = vpop.permute.xlu2 %367 }
  0x71   :  { %vm369_vm8 = vcmp.eq.s32.totalorder %v368_v48, %v1679_v8 }
  0x72   :  { %v1173_v63 = vsel %vm369_vm8, 1.0, %v1528_v15 }
  0x73   :  { %v372_v6 = vpack.c.bf16 %v1173_v63, %v1173_v63 }
  0x74   :  { %v128_v12 = vpop.permute.xlu1 %127  ;;  %v45_v13 = vpop.permute.xlu0 %44 }
  0x75   :  { %vm129_vm1 = vcmp.eq.s32.totalorder %v128_v12, %v1679_v8  ;;  %vm46_vm2 = vcmp.eq.s32.totalorder %v45_v13, %v1679_v8  ;;  %v276_v12 = vpack.c.bf16 %v1143_v4, %v1143_v4  ;;  %v686_v13 = vsel %vm75_vm0, %v679_v1, 0 }
  0x76   :  { %v1098_v16 = vsel %vm129_vm1, 1.0, %v1528_v15  ;;  %v1074_v17 = vsel %vm46_vm2, 1.0, %v1528_v15 }
  0x77   :  { %v132_v19 = vpack.c.bf16 %v1098_v16, %v1098_v16  ;;  %v49_v20 = vpack.c.bf16 %v1074_v17, %v1074_v17  ;;  %v782_v16 = vsel %vm75_vm0, %v775_v5, 0 }
  0x79   :  { %1088 = vmatmul.msk.bf16.vlgmr.msra.gmra.mxu0 %vm71_vm3, %v49_v20  ;;  %1112 = vmatmul.msk.bf16.vlgmr.msra.gmra.mxu2 %vm71_vm3, %v132_v19  ;;  %v512_v7 = vpop.permute.xlu2 %511  ;;  %v823_v19 = vpack.c.b16 %v820_v11, %v820_v11  ;;  %v1429_v11 = vld [vmem:[%s1893_s3 + $0x28] sm:$0xff] }
  0x7a   :  { %453 = vmatpush.bf16.msra.mxu0 %v446_v21  ;;  %549 = vmatpush.bf16.msra.mxu2 %v542_v22  ;;  %vm513_vm11 = vcmp.eq.s32.totalorder %v512_v7, %v1679_v8  ;;  %v1419_v21 = vld [vmem:[%s1891_s1 + $0x134] sm:$0xff] }
  0x7b   :  { %v1218_v20 = vsel %vm513_vm11, 1.0, %v1528_v15 }
  0x7c   :  { %v516_v24 = vpack.c.bf16 %v1218_v20, %v1218_v20 }
  0x7d   :  { %v176_v30 = vpop.permute.xlu1 %175  ;;  %v33_v31 = vpop.permute.xlu0 %32 }
  0x7e   :  { %vm177_vm4 = vcmp.eq.s32.totalorder %v176_v30, %v1679_v8  ;;  %vm34_vm5 = vcmp.eq.s32.totalorder %v33_v31, %v1679_v8  ;;  %454 = vmatpush.bf16.msra.mxu0 %v1405_v25  ;;  %550 = vmatpush.bf16.msra.mxu2 %v1409_v26  ;;  %v1414_v25 = vld [vmem:[%s1891_s1 + $0x104] sm:$0xff]  ;;  %v830_v26 = vsel %vm75_vm0, %v823_v19, 0 }
  0x7f   :  { %v1113_v34 = vsel %vm177_vm4, 1.0, %v1528_v15  ;;  %v1073_v35 = vsel %vm34_vm5, 1.0, %v1528_v15  ;;  %v1421_v30 = vld [vmem:[%s1891_s1 + $0x148] sm:$0xff] }
  0x80   :  { %v180_v38 = vpack.c.bf16 %v1113_v34, %v1113_v34  ;;  %v37_v39 = vpack.c.bf16 %v1073_v35, %v1073_v35 }
  0x82   :  { %1097 = vmatmul.msk.bf16.vlgmr.msra.gmra.mxu1 %vm71_vm3, %v37_v39  ;;  %1127 = vmatmul.msk.bf16.vlgmr.msra.gmra.mxu3 %vm71_vm3, %v180_v38  ;;  %v608_v32 = vpop.permute.xlu2 %607  ;;  %v878_v38 = vsel %vm75_vm0, %v871_v33, 0 }
  0x83   :  { %501 = vmatpush.bf16.msra.mxu1 %v494_v40  ;;  %455 = vmatpush.bf16.msra.mxu0 %v1404_v36  ;;  %vm609_vm14 = vcmp.eq.s32.totalorder %v608_v32, %v1679_v8  ;;  %v1420_v36 = vld [vmem:[%s1891_s1 + $0x140] sm:$0xff] }
  0x84   :  { %597 = vmatpush.bf16.msra.mxu3 %v590_v42  ;;  %551 = vmatpush.bf16.msra.mxu2 %v1408_v41  ;;  %v1248_v40 = vsel %vm609_vm14, 1.0, %v1528_v15  ;;  %v1423_v41 = vld [vmem:[%s1891_s1 + $0x15c] sm:$0xff] }
  0x85   :  { %v612_v43 = vpack.c.bf16 %v1248_v40, %v1248_v40 }
  0x86   :  { %v320_v51 = vpop.permute.xlu1 %319  ;;  %v416_v0 = vpop.permute.xlu0 %415 }
  0x87   :  { %vm321_vm7 = vcmp.eq.s32.totalorder %v320_v51, %v1679_v8  ;;  %502 = vmatpush.bf16.msra.mxu1 %v1407_v44  ;;  %vm417_vm10 = vcmp.eq.s32.totalorder %v416_v0, %v1679_v8 }
  0x88   :  { %v1158_v56 = vsel %vm321_vm7, 1.0, %v1528_v15  ;;  %598 = vmatpush.bf16.msra.mxu3 %v1411_v47  ;;  %v1188_v17 = vsel %vm417_vm10, 1.0, %v1528_v15  ;;  %v1422_v47 = vld [vmem:[%s1891_s1 + $0x154] sm:$0xff] }
  0x89   :  { %v324_v59 = vpack.c.bf16 %v1158_v56, %v1158_v56  ;;  %1142 = vmatmul.msk.bf16.vlgmr.msrb.gmra.mxu0 %vm71_vm3, %v228_v53  ;;  %v420_v22 = vpack.c.bf16 %v1188_v17, %v1188_v17 }
  0x8a   :  { %645 = vmatpush.bf16.msrb.mxu0 %v638_v55 }
  0x8b   :  { %1172 = vmatmul.msk.bf16.vlgmr.msrb.gmra.mxu2 %vm71_vm3, %v324_v59  ;;  %503 = vmatpush.bf16.msra.mxu1 %v1406_v54  ;;  %v752_v44 = vpop.permute.xlu2 %751 }
  0x8c   :  { %599 = vmatpush.bf16.msra.mxu3 %v1410_v57  ;;  %741 = vmatpush.bf16.msrb.mxu2 %v734_v60  ;;  %vm753_vm1 = vcmp.eq.s32.totalorder %v752_v44, %v1679_v8 }
  0x8d   :  { %v1293_v48 = vsel %vm753_vm1, 1.0, %v1528_v15 }
  0x8e   :  { %646 = vmatpush.bf16.msrb.mxu0 %v1413_v62  ;;  %v756_v51 = vpack.c.bf16 %v1293_v48, %v1293_v48  ;;  %v1435_v48 = vld [vmem:[%s1895_s5 + $0x28] sm:$0xff] }
  0x8f   :  { %v464_v9 = vpop.permute.xlu1 %463  ;;  %v656_v45 = vpop.permute.xlu0 %655 }
  0x90   :  { %742 = vmatpush.bf16.msrb.mxu2 %v1417_v2  ;;  %vm465_vm13 = vcmp.eq.s32.totalorder %v464_v9, %v1679_v8  ;;  %vm657_vm2 = vcmp.eq.s32.totalorder %v656_v45, %v1679_v8  ;;  %v913_v2 = vld [vmem:[%s1893_s3 + $0x30] sm:$0x3] }
  0x91   :  { %v1203_v34 = vsel %vm465_vm13, 1.0, %v1528_v15  ;;  %v1263_v49 = vsel %vm657_vm2, 1.0, %v1528_v15  ;;  %v943_v3 = vunpack.c.l.b16 %v913_v2 }
  0x92   :  { %1157 = vmatmul.msk.bf16.vlgmr.msrb.gmra.mxu1 %vm71_vm3, %v276_v12  ;;  %1187 = vmatmul.msk.bf16.vlgmr.msrb.gmra.mxu3 %vm71_vm3, %v372_v6  ;;  %v468_v37 = vpack.c.bf16 %v1203_v34, %v1203_v34  ;;  %v660_v52 = vpack.c.bf16 %v1263_v49, %v1263_v49 }
  0x93   :  { %693 = vmatpush.bf16.msrb.mxu1 %v686_v13  ;;  %647 = vmatpush.bf16.msrb.mxu0 %v1412_v10  ;;  %v950_v6 = vpack.c.b16 %v943_v3, %v943_v3  ;;  %v1432_v3 = vld [vmem:[%s1895_s5 + $0x10] sm:$0xff] }
  0x94   :  { %789 = vmatpush.bf16.msrb.mxu3 %v782_v16  ;;  %743 = vmatpush.bf16.msrb.mxu2 %v1416_v14  ;;  %v848_v55 = vpop.permute.xlu2 %847 }
  0x95   :  { %vm849_vm5 = vcmp.eq.s32.totalorder %v848_v55, %v1679_v8  ;;  %v962_v9 = vsel %vm75_vm0, %v950_v6, 0 }
  0x96   :  { %v1323_v56 = vsel %vm849_vm5, 1.0, %v1528_v15 }
  0x97   :  { %694 = vmatpush.bf16.msrb.mxu1 %v1415_v18  ;;  %v852_v57 = vpack.c.bf16 %v1323_v56, %v1323_v56  ;;  %v1428_v18 = vld [vmem:[%s1893_s3 + $0x20] sm:$0xff] }
  0x98   :  { %v560_v27 = vpop.permute.xlu1 %559  ;;  %790 = vmatpush.bf16.msrb.mxu3 %v1419_v21  ;;  %v1427_v21 = vld [vmem:[%s1893_s3 + $0x18] sm:$0xff] }
  0x99   :  { %1202 = vmatmul.msk.bf16.vlgmr.msra.gmra.mxu0 %vm71_vm3, %v420_v22  ;;  %vm561_vm12 = vcmp.eq.s32.totalorder %v560_v27, %v1679_v8  ;;  %v1426_v27 = vld [vmem:[%s1893_s3 + $0x10] sm:$0xff] }
  0x9a   :  { %837 = vmatpush.bf16.msra.mxu0 %v830_v26  ;;  %v1233_v31 = vsel %vm561_vm12, 1.0, %v1528_v15 }
  0x9b   :  { %1232 = vmatmul.msk.bf16.vlgmr.msra.gmra.mxu2 %vm71_vm3, %v516_v24  ;;  %695 = vmatpush.bf16.msrb.mxu1 %v1414_v25  ;;  %v564_v35 = vpack.c.bf16 %v1233_v31, %v1233_v31 }
  0x9c   :  { %791 = vmatpush.bf16.msrb.mxu3 %v1418_v28  ;;  %965 = vmatpush.bf16.msra.mxu2 %v962_v9 }
  0x9e   :  { %838 = vmatpush.bf16.msra.mxu0 %v1421_v30 }
  0xa0   :  { %966 = vmatpush.bf16.msra.mxu2 %v1429_v11 }
  0xa1   :  { %v704_v39 = vpop.permute.xlu1 %703 }
  0xa2   :  { %1217 = vmatmul.msk.bf16.vlgmr.msra.gmra.mxu1 %vm71_vm3, %v468_v37  ;;  %1247 = vmatmul.msk.bf16.vlgmr.msra.gmra.mxu3 %vm71_vm3, %v564_v35  ;;  %vm705_vm15 = vcmp.eq.s32.totalorder %v704_v39, %v1679_v8  ;;  %v991_v39 = vld [vmem:[%s1895_s5 + $0x30] sm:$0x3] }
  0xa3   :  { %885 = vmatpush.bf16.msra.mxu1 %v878_v38  ;;  %839 = vmatpush.bf16.msra.mxu0 %v1420_v36  ;;  %v1278_v42 = vsel %vm705_vm15, 1.0, %v1528_v15  ;;  %v1424_v36 = vld [vmem:[%s1893_s3] sm:$0xff] }
  0xa4   :  { %v708_v46 = vpack.c.bf16 %v1278_v42, %v1278_v42  ;;  %967 = vmatpush.bf16.msra.mxu2 %v1428_v18 }
  0xa7   :  { %886 = vmatpush.bf16.msra.mxu1 %v1423_v41 }
  0xa8   :  { %968 = vmatpush.bf16.msra.mxu2 %v1427_v21 }
  0xa9   :  { %1262 = vmatmul.msk.bf16.vlgmr.msrb.gmra.mxu0 %vm71_vm3, %v612_v43  ;;  %v1021_v43 = vunpack.c.l.b16 %v991_v39 }
  0xaa   :  { %v800_v50 = vpop.permute.xlu1 %799 }
  0xab   :  { %1292 = vmatmul.msk.bf16.vlgmr.msrb.gmra.mxu2 %vm71_vm3, %v708_v46  ;;  %887 = vmatpush.bf16.msra.mxu1 %v1422_v47  ;;  %vm801_vm4 = vcmp.eq.s32.totalorder %v800_v50, %v1679_v8  ;;  %v1028_v45 = vpack.c.b16 %v1021_v43, %v1021_v43 }
  0xac   :  { %v1308_v53 = vsel %vm801_vm4, 1.0, %v1528_v15  ;;  %969 = vmatpush.bf16.msra.mxu2 %v1426_v27 }
  0xad   :  { %v804_v54 = vpack.c.bf16 %v1308_v53, %v1308_v53  ;;  %v1039_v47 = vsel %vm75_vm0, %v1028_v45, 0  ;;  %vm957_vm0 = vcmask 818176  }
  0xae   :  { %1042 = vmatpush.bf16.msra.mxu3 %v1039_v47 }
  0xb0   :  { %970 = vmatpush.bf16.msra.mxu2 %v1425_v29 }
  0xb2   :  { %1277 = vmatmul.msk.bf16.vlgmr.msrb.gmra.mxu1 %vm71_vm3, %v660_v52  ;;  %1307 = vmatmul.msk.bf16.vlgmr.msrb.gmra.mxu3 %vm71_vm3, %v756_v51 }
  0xb3   :  { %1043 = vmatpush.bf16.msra.mxu3 %v1435_v48 }
  0xb4   :  { %971 = vmatpush.bf16.msra.mxu2 %v1424_v36 }
  0xb9   :  { %1322 = vmatmul.msk.bf16.vlgmr.msra.gmra.mxu0 %vm71_vm3, %v804_v54  ;;  %v1434_v54 = vld [vmem:[%s1895_s5 + $0x20] sm:$0xff] }
  0xba   :  { %1044 = vmatpush.bf16.msra.mxu3 %v1434_v54 }
  0xc2   :  { %1337 = vmatmul.msk.bf16.vlgmr.msra.gmra.mxu1 %vm71_vm3, %v852_v57  ;;  %v1433_v57 = vld [vmem:[%s1895_s5 + $0x18] sm:$0xff]  ;;  %vm1055_vm3 = vcmask 146432  }
  0xc3   :  { %1045 = vmatpush.bf16.msra.mxu3 %v1433_v57 }
  0xc7   :  { %1046 = vmatpush.bf16.msra.mxu3 %v1432_v3 }
  0xf6   :  { %v88_v58 = vpop.f32.mrf.mxu0 }
  0xfc   :  { %v169_v59 = vpop.f32.mrf.mxu2 }
  0xfe   :  { %v90_v60 = vpop.f32.mrf.mxu0 }
  0xff   :  { %v122_v61 = vpop.f32.mrf.mxu1 }
 0x100   :  { %v123_v7 = vadd.f32 %v122_v61, %v88_v58  ;;  %v1475_v61 = vld [vmem:[%s1892_s2] ss:$0 sm:$0xff] }
 0x102   :  { %v173_v10 = vadd.f32 %v169_v59, %v123_v7 }
 0x104   :  { %v171_v62 = vpop.f32.mrf.mxu2 }
 0x105   :  { %v217_v63 = vpop.f32.mrf.mxu3 }
 0x106   :  { %v265_v0 = vpop.f32.mrf.mxu0  ;;  %v221_v13 = vadd.f32 %v217_v63, %v173_v10 }
 0x107   :  { %v124_v1 = vpop.f32.mrf.mxu1 }
 0x108   :  { %v269_v19 = vadd.f32 %v265_v0, %v221_v13 }
 0x10d   :  { %v219_v8 = vpop.f32.mrf.mxu3 }
 0x10e   :  { %v267_v4 = vpop.f32.mrf.mxu0  ;;  %v361_v5 = vpop.f32.mrf.mxu2 }
 0x10f   :  { %v313_v15 = vpop.f32.mrf.mxu1  ;;  %v1431_v4 = vld [vmem:[%s1895_s5 + $0x8] sm:$0xff] }
 0x110   :  { %v317_v20 = vadd.f32 %v313_v15, %v269_v19  ;;  %1047 = vmatpush.bf16.msra.mxu3 %v1431_v4  ;;  %v1476_v15 = vld [vmem:[%s1894_s4] ss:$0 sm:$0xff]  ;;  %s1064_s4 = sshll.u32 %s1897_s7, 4  ;;  %s1065_s4 = int_to_ptr.hbm [resolvable:$true] %s1064_s4 }
 0x112   :  { %v365_v26 = vadd.f32 %v361_v5, %v317_v20  ;;  %v1430_v5 = vld [vmem:[%s1895_s5] sm:$0xff]  ;;  %s1529_s5 = smov [#allocation2]  }
 0x113   :  { %s1062_s20 = sshll.u32 %s1529_s5, 4  ;;  %s1063_s20 = int_to_ptr.vmem [resolvable:$true] %s1062_s20 }
 0x114   :  { %1048 = vmatpush.bf16.msra.mxu3 %v1430_v5 }
 0x115   :  { %v409_v12 = vpop.f32.mrf.mxu3 }
 0x116   :  { %v457_v14 = vpop.f32.mrf.mxu0  ;;  %v363_v16 = vpop.f32.mrf.mxu2  ;;  %v413_v28 = vadd.f32 %v409_v12, %v365_v26  ;;  %v1477_v12 = vld [vmem:[%s1896_s6] ss:$0 sm:$0xff] }
 0x117   :  { %v315_v17 = vpop.f32.mrf.mxu1 }
 0x118   :  { %v461_v31 = vadd.f32 %v457_v14, %v413_v28 }
 0x11d   :  { %v411_v22 = vpop.f32.mrf.mxu3 }
 0x11e   :  { %v459_v23 = vpop.f32.mrf.mxu0  ;;  %v553_v24 = vpop.f32.mrf.mxu2 }
 0x11f   :  { %v505_v25 = vpop.f32.mrf.mxu1 }
 0x120   :  { %v509_v35 = vadd.f32 %v505_v25, %v461_v31 }
 0x122   :  { %v557_v37 = vadd.f32 %v553_v24, %v509_v35 }
 0x125   :  { %v601_v30 = vpop.f32.mrf.mxu3 }
 0x126   :  { %v649_v32 = vpop.f32.mrf.mxu0  ;;  %v555_v33 = vpop.f32.mrf.mxu2  ;;  %v605_v40 = vadd.f32 %v601_v30, %v557_v37 }
 0x127   :  { %v507_v34 = vpop.f32.mrf.mxu1 }
 0x128   :  { %v653_v46 = vadd.f32 %v649_v32, %v605_v40 }
 0x12d   :  { %v603_v38 = vpop.f32.mrf.mxu3 }
 0x12e   :  { %v651_v41 = vpop.f32.mrf.mxu0  ;;  %v745_v42 = vpop.f32.mrf.mxu2 }
 0x12f   :  { %v697_v44 = vpop.f32.mrf.mxu1 }
 0x130   :  { %v701_v49 = vadd.f32 %v697_v44, %v653_v46 }
 0x132   :  { %v749_v55 = vadd.f32 %v745_v42, %v701_v49 }
 0x135   :  { %v793_v50 = vpop.f32.mrf.mxu3 }
 0x136   :  { %v841_v51 = vpop.f32.mrf.mxu0  ;;  %v747_v52 = vpop.f32.mrf.mxu2  ;;  %v797_v56 = vadd.f32 %v793_v50, %v749_v55 }
 0x137   :  { %v699_v53 = vpop.f32.mrf.mxu1 }
 0x138   :  { %v845_v59 = vadd.f32 %v841_v51, %v797_v56 }
 0x13d   :  { %v795_v58 = vpop.f32.mrf.mxu3 }
 0x13e   :  { %v843_v60 = vpop.f32.mrf.mxu0 }
 0x13f   :  { %v889_v62 = vpop.f32.mrf.mxu1 }
 0x140   :  { %v893_v63 = vadd.f32 %v889_v62, %v845_v59 }
 0x142   :  { %v898_v0 = vadd.f32 %v1475_v61, %v893_v63 }
 0x144   :  { %1478 = vtanh.f32 %v898_v0 }
 0x147   :  { %v891_v1 = vpop.f32.mrf.mxu1 }
 0x14a   :  { %v1479_v2 = vpop.eup %1478 }
 0x14b   :  { %v900_v8 = vpack.c.bf16 %v1479_v2, %v1479_v2 }
 0x14d   :  { %1362 = vmatmul.msk.bf16.vlgmr.msra.gmra.mxu2 %vm957_vm0, %v900_v8 }
 0x1d0   :  { %v973_v6 = vpop.f32.mrf.mxu2 }
 0x1d1   :  { %v974_v7 = vadd.f32 %v1476_v15, %v973_v6 }
 0x1d3   :  { %1480 = vtanh.f32 %v974_v7 }
 0x1d8   :  { %v975_v9 = vpop.f32.mrf.mxu2 }
 0x1d9   :  { %v1481_v10 = vpop.eup %1480 }
 0x1da   :  { %v978_v11 = vpack.c.bf16 %v1481_v10, %v1481_v10 }
 0x1dc   :  { %1387 = vmatmul.msk.bf16.vlgmr.msra.gmra.mxu3 %vm957_vm0, %v978_v11 }
 0x25f   :  { %v1050_v13 = vpop.f32.mrf.mxu3 }
 0x260   :  { %v1051_v14 = vadd.f32 %v1477_v12, %v1050_v13 }
 0x262   :  { %1482 = vtanh.f32 %v1051_v14 }
 0x267   :  { %v1052_v16 = vpop.f32.mrf.mxu3 }
 0x268   :  { %v1483_v17 = vpop.eup %1482 }
 0x269   :  { %1056 = vst.msk [vmem:[#allocation2] sm:$0xff] %vm1055_vm3, %v1483_v17 }
 0x26a   :  { %1067 = dma.vmem_to_hbm [thread:$0]  %s1063_s20, 128, %s1065_s4, [#allocation3]  }
 0x26b   :  { %1508 = dma.done.wait [#allocation3], 128  }
 0x26c   :  { %1509 = vsyncadd [#allocation3], 4294967168 }
 0x26d   :  { %1072 = vsyncpa [#allocation3], 1 }

</bundles_post_ra>
